<compile_context>
chip_gen: v5e
topology: v5e:2x2
jax: 0.10.0
libtpu: 0.0.40
codegen_flags: <defaults>
</compile_context>

<pallas_src>
import functools

import jax
import jax.numpy as jnp
from jax import lax
from jax.experimental import pallas as pl
from jax.experimental.pallas import tpu as pltpu

_SUB_CHUNK = 256      # in-kernel M sub-chunk: bounds the low-rank f32 intermediate
_MAX_TILE_M = 1024    # row-tile cap (measured ~86% of HBM roofline at 1024 rows)
_MAX_TILE_N = 2048    # N-tile cap so a huge output_dim doesn't shrink tile_m


def _round_up(x, m):
    return (x + m - 1) // m * m


def _cdiv(a, b):
    return -(-a // b)


def _vmem_limits():
    """Scoped VMEM limit + tiling budget, derived from the chip's VMEM capacity.

    v5e/v6e (128 MiB VMEM)  -> 64 MiB limit / 56 MiB budget.
    v7x     (64 MiB per TC) -> 48 MiB limit / 40 MiB budget.
    """
    try:
        cap = int(pltpu.get_tpu_info().vmem_capacity_bytes)
    except Exception:
        cap = 64 * 1024 * 1024  # conservative fallback: v7x per-TC VMEM
    limit = min((cap * 3) // 4, 64 * 1024 * 1024)
    budget = max(limit - 8 * 1024 * 1024, limit // 2)
    return int(limit), int(budget)


def _choose_tile_m(M, in_dim, out_tile, rank, itemsize, budget):
    """Row tile: multiple of 8, sized from the VMEM budget, capped at 1024."""
    if M <= 8:
        return M  # block == full first dim is always a legal block shape
    M8 = _round_up(M, 8)
    # Double-buffered x rows + out rows per row of tile; A/B double-buffered too.
    per_row = 2 * (in_dim + out_tile) * itemsize
    fixed = 2 * rank * (in_dim + out_tile) * itemsize
    avail = max(budget - fixed, 8 * per_row)
    tile = min(avail // per_row, _MAX_TILE_M, M8)
    if M8 >= 4 * 256:
        # Enough rows that we can guarantee >= 4 grid steps (>= 2 per TensorCore
        # on megacore parts) while keeping >= 256-row tiles.
        tile = min(tile, _round_up(_cdiv(M8, 4), 8))
    else:
        # At least 2 steps so the BlockSpec pipeline has something to prefetch.
        tile = min(tile, _round_up(_cdiv(M8, 2), 8))
    return max(8, int(tile) // 8 * 8)


def _lora_kernel(x_ref, a_ref, b_ref, o_ref, *, chunk):
    # A and B are tiny (rank << dims) and grid-resident; load once per step.
    a = a_ref[...]
    # Keep the low-rank intermediate and second matmul in f32 for accuracy;
    # the second matmul is O(rank) so the extra MXU passes are free under the
    # HBM roofline.
    b = b_ref[...].astype(jnp.float32)

    tile_m = x_ref.shape[0]
    n_full = tile_m // chunk
    tail = tile_m - n_full * chunk

    def compute(r, rows):
        # First matmul on MXU, f32 accumulation: [rows, in] @ [in, rank].
        xa = jnp.dot(x_ref[pl.ds(r, rows), :], a,
                     preferred_element_type=jnp.float32)
        # Second matmul: [rows, rank] @ [rank, out_tile]; direct store.
        o_ref[pl.ds(r, rows), :] = jnp.dot(
            xa, b, preferred_element_type=jnp.float32).astype(o_ref.dtype)

    if n_full > 0:
        def body(c, carry):
            r = pl.multiple_of(c * chunk, chunk)
            compute(r, chunk)
            return carry
        # Bounded unroll: full for <=2 chunks, partial (2) beyond that so the
        # chained matmul intermediates don't blow vreg pressure / spill.
        lax.fori_loop(0, n_full, body, None,
                      unroll=True if n_full <= 2 else 2)
    if tail > 0:
        compute(n_full * chunk, tail)


@functools.partial(jax.jit, static_argnames=("tile_m", "tile_n"))
def lora_forward(x, A, B, *, tile_m=None, tile_n=None):
    """x: [..., input_dim]; A: [input_dim, rank]; B: [rank, output_dim]."""
    orig_shape = x.shape
    input_dim, rank = A.shape
    output_dim = B.shape[1]
    assert orig_shape[-1] == input_dim

    x2d = x.reshape(-1, input_dim)          # free (row-major view)
    M = x2d.shape[0]
    itemsize = jnp.dtype(x.dtype).itemsize

    vmem_limit, vmem_budget = _vmem_limits()

    # Tile N only when output_dim is large; otherwise take the full dim
    # (block last dim == full array dim is always legal, no lane padding).
    if tile_n is None:
        tile_n = output_dim if output_dim <= _MAX_TILE_N else _MAX_TILE_N
    grid_n = _cdiv(output_dim, tile_n)

    if tile_m is None:
        tile_m = _choose_tile_m(M, input_dim, tile_n, rank, itemsize, vmem_budget)
    else:
        tile_m = M if M <= 8 else max(8, _round_up(int(tile_m), 8))
    grid_m = _cdiv(M, tile_m)

    # Advisory cost hint: memory-bound, no transcendentals.
    flops = 2 * M * rank * (input_dim + output_dim)
    bytes_accessed = itemsize * (M * (input_dim + output_dim)
                                 + rank * (input_dim + output_dim))

    out2d = pl.pallas_call(
        functools.partial(_lora_kernel, chunk=_SUB_CHUNK),
        out_shape=jax.ShapeDtypeStruct((M, output_dim), x.dtype),
        grid_spec=pltpu.PrefetchScalarGridSpec(
            num_scalar_prefetch=0,
            grid=(grid_m, grid_n),
            in_specs=[
                # x: streamed row tiles, resident across the (inner) N axis.
                pl.BlockSpec((tile_m, input_dim), lambda i, j: (i, 0)),
                # A: tiny, constant block index -> resident across the grid.
                pl.BlockSpec((input_dim, rank), lambda i, j: (0, 0)),
                # B: tiny, tiled over N only.
                pl.BlockSpec((rank, tile_n), lambda i, j: (0, j)),
            ],
            out_specs=pl.BlockSpec((tile_m, tile_n), lambda i, j: (i, j)),
        ),
        compiler_params=pltpu.CompilerParams(
            # Row tiles are independent -> shard across TCs on megacore parts;
            # N is the inner, sequential axis.
            dimension_semantics=("parallel", "arbitrary"),
            vmem_limit_bytes=vmem_limit,
        ),
        cost_estimate=pl.CostEstimate(
            flops=flops, transcendentals=0, bytes_accessed=bytes_accessed),
    )(x2d, A, B)

    return out2d.reshape(*orig_shape[:-1], output_dim)


if __name__ == "__main__":
    key = jax.random.PRNGKey(0)
    kx, ka, kb, kx2, ka2, kb2, kx3 = jax.random.split(key, 7)

    # Test 1: small shapes matching the LoRALayer forward semantics (f32).
    batch, seq = 2, 8
    input_dim, output_dim, rank = 32, 32, 8
    x = jax.random.normal(kx, (batch, seq, input_dim), dtype=jnp.float32)
    A = jax.random.normal(ka, (input_dim, rank), dtype=jnp.float32)
    B = jax.random.normal(kb, (rank, output_dim), dtype=jnp.float32)

    out = jax.block_until_ready(lora_forward(x, A, B))
    ref = jnp.matmul(jnp.matmul(x, A), B)
    assert out.shape == (batch, seq, output_dim)
    assert jnp.allclose(out, ref, atol=1e-3, rtol=1e-3), "mismatch (f32 aligned)"

    # Test 2: ragged M and non-128-aligned dims (partial last block path).
    x2 = jax.random.normal(kx2, (3, 7, 48), dtype=jnp.float32)
    A2 = jax.random.normal(ka2, (48, 4), dtype=jnp.float32)
    B2 = jax.random.normal(kb2, (4, 80), dtype=jnp.float32)
    out2 = jax.block_until_ready(lora_forward(x2, A2, B2))
    ref2 = jnp.matmul(jnp.matmul(x2, A2), B2)
    assert out2.shape == (3, 7, 80)
    assert jnp.allclose(out2, ref2, atol=1e-3, rtol=1e-3), "mismatch (ragged M)"

    # Test 3: bf16 inputs (fast MXU path on the first matmul).
    x3 = jax.random.normal(kx3, (2, 5, 32), dtype=jnp.bfloat16)
    A3 = A.astype(jnp.bfloat16)
    B3 = B.astype(jnp.bfloat16)
    out3 = jax.block_until_ready(lora_forward(x3, A3, B3))
    ref3 = jnp.matmul(jnp.matmul(x3.astype(jnp.float32), A3.astype(jnp.float32)),
                      B3.astype(jnp.float32))
    assert out3.shape == (2, 5, 32)
    assert jnp.allclose(out3.astype(jnp.float32), ref3, atol=0.5, rtol=5e-2), \
        "mismatch (bf16)"

    print("KERNEL_OK")
</pallas_src>

<mosaic_0001>
module attributes {stable_mosaic.version = 11 : i64} {
  func.func @_lora_kernel(%arg0: i32, %arg1: i32, %arg2: memref<8x32xf32, #tpu.memory_space<vmem>>, %arg3: memref<32x8xf32, #tpu.memory_space<vmem>>, %arg4: memref<8x32xf32, #tpu.memory_space<vmem>>, %arg5: memref<8x32xf32, #tpu.memory_space<vmem>>) attributes {dimension_semantics = [#tpu.dimension_semantics<parallel>, #tpu.dimension_semantics<arbitrary>], iteration_bounds = array<i64: 2, 1>, scalar_prefetch = 0 : i64, scratch_operands = 0 : i64, tpu.core_type = #tpu.core_type<tc>, window_params = [{transform_indices = @transform_0, window_bounds = array<i64: 8, 32>}, {pipeline_mode = #tpu.pipeline_mode<synchronous>, transform_indices = @transform_1, window_bounds = array<i64: 32, 8>}, {transform_indices = @transform_2, window_bounds = array<i64: 8, 32>}, {transform_indices = @transform_3, window_bounds = array<i64: 8, 32>}]} {
    %c0 = arith.constant 0 : index
    %c0_0 = arith.constant 0 : index
    %0 = vector.load %arg3[%c0, %c0_0] : memref<32x8xf32, #tpu.memory_space<vmem>>, vector<32x8xf32>
    %c0_1 = arith.constant 0 : index
    %c0_2 = arith.constant 0 : index
    %1 = vector.load %arg4[%c0_1, %c0_2] : memref<8x32xf32, #tpu.memory_space<vmem>>, vector<8x32xf32>
    %c0_3 = arith.constant 0 : index
    %c0_4 = arith.constant 0 : index
    %2 = vector.load %arg2[%c0_3, %c0_4] : memref<8x32xf32, #tpu.memory_space<vmem>>, vector<8x32xf32>
    %cst = arith.constant dense<0.000000e+00> : vector<8x8xf32>
    %3 = tpu.matmul %2, %0, %cst {dimension_numbers = #tpu.dot_dimension_numbers<[1], [0], [0], [1], [0, 0, 1, 1], [], []>} : vector<8x32xf32>, vector<32x8xf32>, vector<8x8xf32> -> vector<8x8xf32>
    %cst_5 = arith.constant dense<0.000000e+00> : vector<8x32xf32>
    %4 = tpu.matmul %3, %1, %cst_5 {dimension_numbers = #tpu.dot_dimension_numbers<[1], [0], [0], [1], [0, 0, 1, 1], [], []>} : vector<8x8xf32>, vector<8x32xf32>, vector<8x32xf32> -> vector<8x32xf32>
    %c0_6 = arith.constant 0 : index
    %c0_7 = arith.constant 0 : index
    %5 = vector.load %arg5[%c0_6, %c0_7] : memref<8x32xf32, #tpu.memory_space<vmem>>, vector<8x32xf32>
    tpu.vector_store %arg5[%c0_6, %c0_7], %4 {strides = array<i32>} : memref<8x32xf32, #tpu.memory_space<vmem>>, vector<8x32xf32>,
    return
  }
  func.func @transform_0(%arg0: i32, %arg1: i32) -> (i32, i32) {
    %c0_i32 = arith.constant 0 : i32
    %c0_i32_0 = arith.constant 0 : i32
    return %arg0, %c0_i32 : i32, i32
  }
  func.func @transform_1(%arg0: i32, %arg1: i32) -> (i32, i32) {
    %c0_i32 = arith.constant 0 : i32
    %c0_i32_0 = arith.constant 0 : i32
    %c0_i32_1 = arith.constant 0 : i32
    return %c0_i32, %c0_i32_0 : i32, i32
  }
  func.func @transform_2(%arg0: i32, %arg1: i32) -> (i32, i32) {
    %c0_i32 = arith.constant 0 : i32
    %c0_i32_0 = arith.constant 0 : i32
    return %c0_i32, %arg1 : i32, i32
  }
  func.func @transform_3(%arg0: i32, %arg1: i32) -> (i32, i32) {
    %c0_i32 = arith.constant 0 : i32
    return %arg0, %arg1 : i32, i32
  }
}

</mosaic_0001>

<bundles_post_ra>
// kernel: lora_forward.1
= control target key start
LH: loop header
LB: loop body
LE: loop exit
PB: predicated region body
PF: predicated region fallthrough
CT: control target
= control target key end

     0   :  { %8 = vsyncpa [#allocation3], 0  ;;  %s635_s0 = inlined_call_operand.vmem [shape: f32[16,32], index: 0, kind: input, shape index: {}]   ;;  %s636_s1 = inlined_call_operand.vmem [shape: f32[32,8], index: 1, kind: input, shape index: {}]   ;;  %s637_s2 = inlined_call_operand.vmem [shape: f32[8,32], index: 2, kind: input, shape index: {}]   ;;  %s638_s3 = inlined_call_operand.hbm [shape: f32[16,32], index: 3, kind: output, shape index: {}]  }
   0x1   :  { %10 = vsyncpa [#allocation3 + $0x1], 0  ;;  %s521_s12 = smov 0   ;;  %s523_s13 = smov 0  }
   0x2   :  { %s525_s14 = smov 0   ;;  %s527_s15 = smov 0  }
   0x3   :  { %s529_s16 = smov 0   ;;  %s531_s17 = smov 0  }
   0x4 LB: > { %s352_s18 = sadd.s32 4294967295, %s499_s17   ;;  %s353_s19 = sadd.s32 4294967294, %s499_s17   ;;  %s499_s17 = sphi %s531_s17, %s16_s17   ;;  %s495_s16 = sphi %s529_s16, %s645_s16   ;;  %s491_s15 = sphi %s527_s15, %s644_s15   ;;  %s487_s14 = sphi %s525_s14, %s643_s14   ;;  %s483_s13 = sphi %s523_s13, %s642_s13   ;;  %s479_s12 = sphi %s521_s12, %s641_s12  }
   0x5   : > { %s28_s20 = sadd.s32 1, %s495_s16  ;;  %s110_s21 = sadd.s32 1, %s487_s14 }
   0x6   : > { %p30_p0 = scmp.ge.s32.totalorder %s28_s20, 2  ;;  %p120_p1 = scmp.ne.s32.totalorder %s487_s14, %s483_s13 }
   0x7   : > { %p121_p2 = scmp.eq.s32.totalorder %s352_s18, 1  ;;  %p126_p3 = scmp.ne.s32.totalorder %s483_s13, %s479_s12 }
   0x8   : > { %s647_s20 = smov (%p30_p0, %s28_s20), 0  ;;  %p127_p5 = scmp.eq.s32.totalorder %s353_s19, 1 }
   0x9   : > { %p561_p4 = por %p121_p2, %p120_p1  ;;  %s105_s23 = ssub.s32 %s495_s16, %s647_s20 }
   0xa   : > { %p357_p6 = scmp.ge.s32.totalorder %s499_s17, 1  ;;  %p108_p7 = scmp.eq.s32.totalorder %s105_s23, 0 }
   0xb   : > { %p568_p8 = por %p127_p5, %p126_p3  ;;  %p162_p9 = scmp.lt.s32.totalorder %s499_s17, 3 }
   0xc   : > { %s574_s25 = scalar_select %p108_p7, %s487_s14, %s110_s21  }
   0xd   : > { %p163_p10 = pnand %p357_p6, %p162_p9 }
   0xe   : > { %p189_p11 = scmp.lt.s32.totalorder (!%p163_p10), %s491_s15, 1  ;;  %s186_s21 = sand.u32 (!%p163_p10), 1, %s483_s13  }
   0xf   : > { %166 = sbr.rel (%p163_p10) target bundleno = 283 (0x11b), region = 32  ;;  %s358_s23 = sshll.u32 (!%p163_p10), %s186_s21, 3 }
  0x10   : > { %s363_s26 = sshll.u32 (!%p163_p10), %s491_s15, 3  ;;  %s188_s30 = scalar_lea.vmem (!%p163_p10), [#allocation2], %s358_s23 }
  0x11   : > { %s264_s29 = scalar_lea.hbm (!%p163_p10), %s638_s3, %s363_s26  ;;  %s266_s4 = sshll.u32 (!%p163_p10), %s188_s30, 4  ;;  %s267_s4 = int_to_ptr.vmem [resolvable:$true] %s266_s4 }
  0x12   : > { %s253_s6 = scalar_lea.sflag (!%p163_p10), [#allocation3], %s186_s21  ;;  %s441_s10 = scalar_lea.hbm (!%p163_p10), %s638_s3, 16 }
  0x14   : > { %v200_v0 = vld [vmem:[%s636_s1 + $0x18] sm:$0xff]  ;;  %v199_v1 = vld [vmem:[%s636_s1 + $0x10] sm:$0xff]  ;;  %v198_v2 = vld [vmem:[%s636_s1 + $0x8] sm:$0xff]  ;;  %s190_s5 = scalar_select %p189_p11, %s491_s15, 1  ;;  %vm203_vm0 = vcmask 261120   ;;  %vm227_vm1 = vcmask 64512  }
  0x15   : > { %219 = vmatpush.msra.mxu0 %v200_v0  ;;  %v197_v3 = vld [vmem:[%s636_s1] sm:$0xff] }
  0x16   : > { %s359_s8 = sshll.u32 %s190_s5, 3  ;;  %v201_v5 = vld [vmem:[%s637_s2] sm:$0xff]  ;;  %s268_s5 = sshll.u32 %s264_s29, 4  ;;  %s269_s5 = int_to_ptr.hbm [resolvable:$true] %s268_s5 }
  0x17   : > { %220 = vmatpush.msra.mxu0 %v199_v1  ;;  %s192_s11 = scalar_lea.vmem %s635_s0, %s359_s8  ;;  %246 = vmatpush.msra.mxu1 %v201_v5  ;;  %s435_s7 = sshra.s32 %s269_s5, 4  ;;  %s436_s7 = int_to_ptr.hbm [resolvable:$true] %s435_s7 }
  0x18   : > { %v202_v4 = vld [vmem:[%s192_s11] sm:$0xff]  ;;  %s437_s8 = scalar_lea.hbm %s436_s7, 8  ;;  %p442_p1 = scmp.lt.s32.totalorder %s436_s7, %s638_s3 }
  0x19   : > { %221 = vmatpush.msra.mxu0 %v198_v2  ;;  %p438_p12 = scmp.ne.s32.totalorder %s436_s7, %s437_s8  ;;  %p443_p2 = scmp.lt.s32.totalorder %s441_s10, %s437_s8 }
  0x1b   : > { %222 = vmatpush.msra.mxu0 %v197_v3  ;;  %p439_p13 = pnand %p438_p12, %p561_p4  ;;  %p444_p3 = por %p443_p2, %p442_p1 }
  0x1c   : > { %360 = vmatmul.msk.f32.vlgmr.msra.gmra.mxu0 %vm203_vm0, %v202_v4 }
  0x1d   : > { %p440_p0 = pneg %p439_p13 }
  0x1f   : > { %p445_p5 = pnand %p444_p3, %p440_p0 }
  0x99   : > { %v224_v6 = vpop.f32.mrf.mxu0 }
  0x9a   : > { %361 = vmatmul.msk.f32.vlgmr.msra.gmra.mxu1 %vm227_vm1, %v224_v6 }
 0x117   : > { %v248_v7 = vpop.f32.mrf.mxu1 }
 0x118   : > { %251 = vst.msk [vmem:[%s188_s30] sm:$0xff] %vm203_vm0, %v248_v7 }
 0x119   : > { %448 = shalt.err (!%p445_p5)
}
 0x11a   : > { %366 = dma.vmem_to_hbm [thread:$0]  (%p561_p4), %s267_s4, 128, %s269_s5, %s253_s6  }
 0x11b PF: > { %p372_p6 = scmp.ge.s32.totalorder %s499_s17, 2  ;;  %s280_s19 = sand.u32 1, %s479_s12  }
 0x11c   : > { %s281_s21 = scalar_lea.sflag [#allocation3], %s280_s19 }
 0x11d   : > { %p369_p7 = pnand %p372_p6, %p568_p8 }
 0x11f   : > { %p370_p9 = pneg %p369_p7 }
 0x121   : > { %474 = dma.done.wait (%p370_p9), %s281_s21, 128  }
 0x122   : > { %476 = vsyncadd (%p370_p9), %s281_s21, 4294967168  ;;  %s16_s17 = sadd.s32 1, %s499_s17   ;;  %s641_s12 = smov %s483_s13 }
 0x123   : > { %p13_p10 = scmp.ge.s32.totalorder %s16_s17, 4   ;;  %s642_s13 = smov %s487_s14 }
 0x124   : > { %s643_s14 = smov %s574_s25  ;;  %s644_s15 = smov %s495_s16 }
 0x125   : > { %s645_s16 = smov %s647_s20  ;;  %15 = sbr.rel (!%p13_p10) target bundleno = 4 (0x4), region = 70 }
 0x12a   :  { %287 = vsyncpa [#allocation3], 1 }
 0x12b   :  { %289 = vsyncpa [#allocation3 + $0x1], 1 }

</bundles_post_ra>
